<compile_context>
chip_gen: v7x
topology: tpu7x:2x2x1
jax: 0.10.0
libtpu: 0.0.40
codegen_flags: <defaults>
</compile_context>

<pallas_src>
import functools

import jax
import jax.numpy as jnp
from jax.experimental import pallas as pl
from jax.experimental.pallas import tpu as pltpu

F32 = jnp.float32


def _cdiv(a, b):
    return -(-a // b)


def _round_up(a, b):
    return _cdiv(a, b) * b


def _choose_tile_m(m128, cap):
    """Pick TILE_M (multiple of 128): minimize padded rows, prefer >=2 grid steps
    (v7x has 2 TensorCores), tie-break on the largest tile (fewest grid steps)."""
    cap = max(128, (cap // 128) * 128)
    cands = list(range(128, min(cap, m128) + 1, 128))
    if m128 >= 256:
        multi = [t for t in cands if _cdiv(m128, t) >= 2]
        if multi:
            cands = multi
    return min(cands, key=lambda t: (_cdiv(m128, t) * t, -t))


def _fused_mlp_kernel(x_ref, w_ref, b_ref, w2_ref, o_ref, *, n_hidden):
    # x_ref : (TILE_MP, P)           packed activations (P = pack*H)
    # w_ref : (n_hidden, P, P)       block-diagonal hidden weights (resident in VMEM)
    # b_ref : (n_hidden, 1, P)       tiled hidden biases
    # w2_ref: (P, pack*out_dim)      block-diagonal head weights (no head bias in-kernel)
    # o_ref : (TILE_MP, pack*out_dim)
    h = x_ref[...]
    for i in range(n_hidden):  # static unroll; weights never leave VMEM
        h = jnp.maximum(
            jnp.dot(h, w_ref[i], preferred_element_type=jnp.float32) + b_ref[i], 0.0)
    o_ref[...] = jnp.dot(h, w2_ref[...], preferred_element_type=jnp.float32)


def decoder_mlp(x, hidden_layers, w_out, b_out, *, tile_m=8192):
    """Pallas equivalent of decoder_MLP.forward.

    x             : (..., H) float32
    hidden_layers : list of (W (H,H), b (H,))  -- the L-1 Linear+ReLU layers
    w_out, b_out  : (H, out_dim), (out_dim,)
    returns       : (...,) if out_dim == 1 (torch .squeeze(-1)) else (..., out_dim)
    """
    H = x.shape[-1]
    out_dim = w_out.shape[-1]
    lead = x.shape[:-1]
    M = 1
    for d in lead:
        M *= d
    n_hidden = len(hidden_layers)

    # Lane packing: put `pack` consecutive rows side by side along the lane axis.
    pack = 128 // H if (H <= 128 and 128 % H == 0) else 1
    P = pack * H

    # Row tiling / padding: pad to a multiple of 128, pick the lowest-waste TILE_M.
    M128 = _round_up(max(M, 1), 128)
    TILE_M = _choose_tile_m(M128, tile_m)
    n_tiles = _cdiv(M128, TILE_M)
    M_pad = n_tiles * TILE_M
    TILE_MP = TILE_M // pack          # packed rows per tile (multiple of 32 >= 8)

    x2 = x.reshape(M, H).astype(F32)
    if M_pad != M:
        x2 = jnp.pad(x2, ((0, M_pad - M), (0, 0)))
    xp = x2.reshape(M_pad // pack, P)             # contiguous reshape, no data movement

    # Stacked hidden weights/biases, expanded to block-diagonal / tiled layouts.
    Ws = jnp.stack([w.astype(F32) for w, _ in hidden_layers])     # (n_hidden, H, H)
    Bs = jnp.stack([b.astype(F32) for _, b in hidden_layers])     # (n_hidden, H)
    w2 = w_out.astype(F32)                                        # (H, out_dim)
    if pack > 1:
        eye = jnp.eye(pack, dtype=F32)
        Ws = jax.vmap(lambda w: jnp.kron(eye, w))(Ws)             # (n_hidden, P, P)
        Bs = jnp.tile(Bs, (1, pack))                              # (n_hidden, P)
        w2 = jnp.kron(eye, w2)                                    # (P, pack*out_dim)
    Bs = Bs[:, None, :]                                           # (n_hidden, 1, P)

    in_specs = [
        pl.BlockSpec((TILE_MP, P), lambda i: (i, 0)),
        pl.BlockSpec((n_hidden, P, P), lambda i: (0, 0, 0)),
        pl.BlockSpec((n_hidden, 1, P), lambda i: (0, 0, 0)),
        pl.BlockSpec((P, pack * out_dim), lambda i: (0, 0)),
    ]
    args = [xp, Ws, Bs, w2]

    out_shape = jax.ShapeDtypeStruct((M_pad // pack, pack * out_dim), F32)
    out_specs = pl.BlockSpec((TILE_MP, pack * out_dim), lambda i: (i, 0))

    kern = functools.partial(_fused_mlp_kernel, n_hidden=n_hidden)

    out = pl.pallas_call(
        kern,
        out_shape=out_shape,
        grid=(n_tiles,),
        in_specs=in_specs,
        out_specs=out_specs,
        compiler_params=pltpu.CompilerParams(dimension_semantics=("parallel",)),
    )(*args)

    # (M_pad//pack, pack*out_dim) flattens row-major into original row order.
    y = out.reshape(M_pad, out_dim)[:M] + b_out.astype(F32)
    if out_dim == 1:
        return y[:, 0].reshape(lead)
    return y.reshape(lead + (out_dim,))


# ------------------------------ reference & init ------------------------------

def decoder_mlp_ref(x, hidden_layers, w_out, b_out):
    h = x.astype(F32)
    for w, b in hidden_layers:
        h = jnp.maximum(h @ w + b, 0.0)
    y = h @ w_out + b_out
    return jnp.squeeze(y, -1) if w_out.shape[-1] == 1 else y


def init_decoder_params(key, hidden_dim, output_dim, L):
    assert L > 1
    keys = jax.random.split(key, 2 * L)

    def dense(kw, kb, fan_in, fan_out):
        bound = 1.0 / (float(fan_in) ** 0.5)
        w = jax.random.uniform(kw, (fan_in, fan_out), F32, -bound, bound)
        b = jax.random.uniform(kb, (fan_out,), F32, -bound, bound)
        return w, b

    hidden = [dense(keys[2 * i], keys[2 * i + 1], hidden_dim, hidden_dim)
              for i in range(L - 1)]
    w_out, b_out = dense(keys[-2], keys[-1], hidden_dim, output_dim)
    return hidden, w_out, b_out


# ------------------------------------ main ------------------------------------

if __name__ == "__main__":
    hidden_dim, output_dim, L = 32, 1, 3
    bsz, N = 2, 16                        # parent model feeds (bsz, N*N, hidden_dim)

    key = jax.random.PRNGKey(0)
    kp, kx = jax.random.split(key)
    hidden, w_out, b_out = init_decoder_params(kp, hidden_dim, output_dim, L)

    fwd = jax.jit(functools.partial(decoder_mlp, tile_m=8192))

    # Main case: M = bsz*N*N = 512 rows -> 2 parallel grid tiles of 256 rows.
    x = jax.random.normal(kx, (bsz, N * N, hidden_dim), F32)
    y = fwd(x, hidden, w_out, b_out)
    jax.block_until_ready(y)
    y_ref = decoder_mlp_ref(x, hidden, w_out, b_out)
    assert y.shape == (bsz, N * N)
    assert bool(jnp.all(jnp.isfinite(y)))
    assert bool(jnp.allclose(y, y_ref, atol=1e-4, rtol=1e-4))

    # Ragged case: M = 273 rows -> exercises pack/row padding and slicing.
    x2 = jax.random.normal(jax.random.fold_in(kx, 1), (3, 91, hidden_dim), F32)
    y2 = fwd(x2, hidden, w_out, b_out)
    jax.block_until_ready(y2)
    y2_ref = decoder_mlp_ref(x2, hidden, w_out, b_out)
    assert y2.shape == (3, 91)
    assert bool(jnp.allclose(y2, y2_ref, atol=1e-4, rtol=1e-4))

    print("KERNEL_OK")
</pallas_src>

<mosaic_0001>
module attributes {stable_mosaic.version = 11 : i64} {
  func.func @_fused_mlp_kernel(%arg0: i32, %arg1: memref<64x128xf32, #tpu.memory_space<vmem>>, %arg2: memref<2x128x128xf32, #tpu.memory_space<vmem>>, %arg3: memref<2x1x128xf32, #tpu.memory_space<vmem>>, %arg4: memref<128x4xf32, #tpu.memory_space<vmem>>, %arg5: memref<64x4xf32, #tpu.memory_space<vmem>>) attributes {dimension_semantics = [#tpu.dimension_semantics<parallel>], iteration_bounds = array<i64: 2>, scalar_prefetch = 0 : i64, scratch_operands = 0 : i64, tpu.core_type = #tpu.core_type<tc>, window_params = [{transform_indices = @transform_0, window_bounds = array<i64: 64, 128>}, {pipeline_mode = #tpu.pipeline_mode<synchronous>, transform_indices = @transform_1, window_bounds = array<i64: 2, 128, 128>}, {pipeline_mode = #tpu.pipeline_mode<synchronous>, transform_indices = @transform_2, window_bounds = array<i64: 2, 1, 128>}, {pipeline_mode = #tpu.pipeline_mode<synchronous>, transform_indices = @transform_3, window_bounds = array<i64: 128, 4>}, {transform_indices = @transform_4, window_bounds = array<i64: 64, 4>}]} {
    %c0 = arith.constant 0 : index
    %c0_0 = arith.constant 0 : index
    %0 = vector.load %arg1[%c0, %c0_0] : memref<64x128xf32, #tpu.memory_space<vmem>>, vector<64x128xf32>
    %c0_1 = arith.constant 0 : index
    %c0_2 = arith.constant 0 : index
    %c0_3 = arith.constant 0 : index
    %1 = vector.load %arg2[%c0_1, %c0_2, %c0_3] : memref<2x128x128xf32, #tpu.memory_space<vmem>>, vector<1x128x128xf32>
    %2 = vector.shape_cast %1 : vector<1x128x128xf32> to vector<128x128xf32>
    %cst = arith.constant dense<0.000000e+00> : vector<64x128xf32>
    %3 = tpu.matmul %0, %2, %cst {dimension_numbers = #tpu.dot_dimension_numbers<[1], [0], [0], [1], [0, 0, 1, 1], [], []>} : vector<64x128xf32>, vector<128x128xf32>, vector<64x128xf32> -> vector<64x128xf32>
    %c0_4 = arith.constant 0 : index
    %c0_5 = arith.constant 0 : index
    %c0_6 = arith.constant 0 : index
    %4 = vector.load %arg3[%c0_4, %c0_5, %c0_6] : memref<2x1x128xf32, #tpu.memory_space<vmem>>, vector<1x1x128xf32>
    %5 = vector.shape_cast %4 : vector<1x1x128xf32> to vector<1x128xf32>
    %6 = vector.broadcast %5 : vector<1x128xf32> to vector<64x128xf32>
    %7 = arith.addf %3, %6 : vector<64x128xf32>
    %cst_7 = arith.constant 0.000000e+00 : f32
    %8 = vector.broadcast %cst_7 : f32 to vector<64x128xf32>
    %9 = arith.maximumf %7, %8 : vector<64x128xf32>
    %c1 = arith.constant 1 : index
    %c0_8 = arith.constant 0 : index
    %c0_9 = arith.constant 0 : index
    %10 = vector.load %arg2[%c1, %c0_8, %c0_9] : memref<2x128x128xf32, #tpu.memory_space<vmem>>, vector<1x128x128xf32>
    %11 = vector.shape_cast %10 : vector<1x128x128xf32> to vector<128x128xf32>
    %cst_10 = arith.constant dense<0.000000e+00> : vector<64x128xf32>
    %12 = tpu.matmul %9, %11, %cst_10 {dimension_numbers = #tpu.dot_dimension_numbers<[1], [0], [0], [1], [0, 0, 1, 1], [], []>} : vector<64x128xf32>, vector<128x128xf32>, vector<64x128xf32> -> vector<64x128xf32>
    %c1_11 = arith.constant 1 : index
    %c0_12 = arith.constant 0 : index
    %c0_13 = arith.constant 0 : index
    %13 = vector.load %arg3[%c1_11, %c0_12, %c0_13] : memref<2x1x128xf32, #tpu.memory_space<vmem>>, vector<1x1x128xf32>
    %14 = vector.shape_cast %13 : vector<1x1x128xf32> to vector<1x128xf32>
    %15 = vector.broadcast %14 : vector<1x128xf32> to vector<64x128xf32>
    %16 = arith.addf %12, %15 : vector<64x128xf32>
    %cst_14 = arith.constant 0.000000e+00 : f32
    %17 = vector.broadcast %cst_14 : f32 to vector<64x128xf32>
    %18 = arith.maximumf %16, %17 : vector<64x128xf32>
    %c0_15 = arith.constant 0 : index
    %c0_16 = arith.constant 0 : index
    %19 = vector.load %arg4[%c0_15, %c0_16] : memref<128x4xf32, #tpu.memory_space<vmem>>, vector<128x4xf32>
    %cst_17 = arith.constant dense<0.000000e+00> : vector<64x4xf32>
    %20 = tpu.matmul %18, %19, %cst_17 {dimension_numbers = #tpu.dot_dimension_numbers<[1], [0], [0], [1], [0, 0, 1, 1], [], []>} : vector<64x128xf32>, vector<128x4xf32>, vector<64x4xf32> -> vector<64x4xf32>
    %c0_18 = arith.constant 0 : index
    %c0_19 = arith.constant 0 : index
    %21 = vector.load %arg5[%c0_18, %c0_19] : memref<64x4xf32, #tpu.memory_space<vmem>>, vector<64x4xf32>
    tpu.vector_store %arg5[%c0_18, %c0_19], %20 {strides = array<i32>} : memref<64x4xf32, #tpu.memory_space<vmem>>, vector<64x4xf32>,
    return
  }
  func.func @transform_0(%arg0: i32) -> (i32, i32) {
    %c0_i32 = arith.constant 0 : i32
    %c0_i32_0 = arith.constant 0 : i32
    return %arg0, %c0_i32 : i32, i32
  }
  func.func @transform_1(%arg0: i32) -> (i32, i32, i32) {
    %c0_i32 = arith.constant 0 : i32
    %c0_i32_0 = arith.constant 0 : i32
    %c0_i32_1 = arith.constant 0 : i32
    %c0_i32_2 = arith.constant 0 : i32
    return %c0_i32, %c0_i32_0, %c0_i32_1 : i32, i32, i32
  }
  func.func @transform_2(%arg0: i32) -> (i32, i32, i32) {
    %c0_i32 = arith.constant 0 : i32
    %c0_i32_0 = arith.constant 0 : i32
    %c0_i32_1 = arith.constant 0 : i32
    %c0_i32_2 = arith.constant 0 : i32
    return %c0_i32, %c0_i32_0, %c0_i32_1 : i32, i32, i32
  }
  func.func @transform_3(%arg0: i32) -> (i32, i32) {
    %c0_i32 = arith.constant 0 : i32
    %c0_i32_0 = arith.constant 0 : i32
    %c0_i32_1 = arith.constant 0 : i32
    return %c0_i32, %c0_i32_0 : i32, i32
  }
  func.func @transform_4(%arg0: i32) -> (i32, i32) {
    %c0_i32 = arith.constant 0 : i32
    %c0_i32_0 = arith.constant 0 : i32
    return %arg0, %c0_i32 : i32, i32
  }
}

</mosaic_0001>

<bundles_post_ra>
// kernel: decoder_mlp.1
= control target key start
LH: loop header
LB: loop body
LE: loop exit
PB: predicated region body
PF: predicated region fallthrough
CT: control target
= control target key end

     0   :  { %s1056_s15 = smov 0   ;;  %s1248_s0 = inlined_call_operand.vmem [shape: f32[128,128], index: 0, kind: input, shape index: {}]   ;;  %s1249_s1 = inlined_call_operand.vmem [shape: f32[2,128,128], index: 1, kind: input, shape index: {}]   ;;  %s1250_s2 = inlined_call_operand.vmem [shape: f32[2,1,128], index: 2, kind: input, shape index: {}]   ;;  %s1251_s3 = inlined_call_operand.vmem [shape: f32[128,4], index: 3, kind: input, shape index: {}]   ;;  %s1252_s4 = inlined_call_operand.vmem [shape: f32[128,4], index: 4, kind: output, shape index: {}]  }
   0x1 LB: > { %s669_s16 = sadd.s32 4294967295, %s1029_s15   ;;  %p673_p0 = scmp.ge.s32.totalorder %s1029_s15, 1  ;;  %s1029_s15 = sphi %s1056_s15, %s14_s15  }
   0x2   : > { %p163_p1 = scmp.lt.s32.totalorder %s1029_s15, 3 }
   0x4   : > { %p164_p2 = pnand %p673_p0, %p163_p1 }
   0x5   : > { %v209_v0 = vld [vmem:[%s1249_s1] sm:$0xff] (!%p164_p2)  ;;  %v210_v1 = vld [vmem:[%s1249_s1 + $0x8] sm:$0xff] (!%p164_p2)  ;;  %v211_v2 = vld [vmem:[%s1249_s1 + $0x10] sm:$0xff] (!%p164_p2)  ;;  %s674_s23 = sshll.u32 (!%p164_p2), %s669_s16, 3  ;;  %vm604_vm0 = vcmask (!%p164_p2), 31744  }
   0x6   : > { %167 = sbr.rel (%p164_p2) target bundleno = 702 (0x2be), region = 36  ;;  %v903_v3 = vpack.c.bf16 (!%p164_p2), %v210_v1, %v209_v0  ;;  %v212_v4 = vld [vmem:[%s1249_s1 + $0x18] sm:$0xff] (!%p164_p2)  ;;  %p190_p3 = scmp.lt.s32.totalorder (!%p164_p2), %s674_s23, 15  ;;  %v213_v6 = vld [vmem:[%s1249_s1 + $0x20] sm:$0xff] (!%p164_p2)  ;;  %v214_v7 = vld [vmem:[%s1249_s1 + $0x28] sm:$0xff] (!%p164_p2) }
   0x7   : > { %v907_v5 = vpack.c.bf16 (!%p164_p2), %v212_v4, %v211_v2  ;;  %v911_v8 = vpack.c.bf16 (!%p164_p2), %v214_v7, %v213_v6  ;;  %v215_v9 = vld [vmem:[%s1249_s1 + $0x30] sm:$0xff] (!%p164_p2)  ;;  %v679_v10 = vld [vmem:[%s1249_s1 + $0x80] sm:$0xff] (!%p164_p2)  ;;  %v680_v11 = vld [vmem:[%s1249_s1 + $0x88] sm:$0xff] (!%p164_p2) }
   0x8   : > { %904 = vmatprep.subr.bf16.mxu0 (!%p164_p2), %v903_v3  ;;  %v216_v12 = vld [vmem:[%s1249_s1 + $0x38] sm:$0xff] (!%p164_p2)  ;;  %v935_v13 = vpack.c.bf16 (!%p164_p2), %v680_v11, %v679_v10  ;;  %v681_v14 = vld [vmem:[%s1249_s1 + $0x90] sm:$0xff] (!%p164_p2)  ;;  %v683_v18 = vld [vmem:[%s1249_s1 + $0xa0] sm:$0xff] (!%p164_p2) }
   0x9   : > { %906 = vmatpush3.bf16.msra.mxu0 (!%p164_p2), %v903_v3  ;;  %v682_v15 = vld [vmem:[%s1249_s1 + $0x98] sm:$0xff] (!%p164_p2)  ;;  %v915_v19 = vpack.c.bf16 (!%p164_p2), %v216_v12, %v215_v9  ;;  %v684_v20 = vld [vmem:[%s1249_s1 + $0xa8] sm:$0xff] (!%p164_p2)  ;;  %v217_v21 = vld [vmem:[%s1249_s1 + $0x40] sm:$0xff] (!%p164_p2) }
   0xa   : > { %908 = vmatprep.subr.bf16.mxu0 (!%p164_p2), %v907_v5  ;;  %v939_v17 = vpack.c.bf16 (!%p164_p2), %v682_v15, %v681_v14  ;;  %936 = vmatprep.subr.bf16.mxu1 (!%p164_p2), %v935_v13  ;;  %v218_v22 = vld [vmem:[%s1249_s1 + $0x48] sm:$0xff] (!%p164_p2)  ;;  %v943_v23 = vpack.c.bf16 (!%p164_p2), %v684_v20, %v683_v18  ;;  %v685_v24 = vld [vmem:[%s1249_s1 + $0xb0] sm:$0xff] (!%p164_p2)  ;;  %v686_v25 = vld [vmem:[%s1249_s1 + $0xb8] sm:$0xff] (!%p164_p2) }
   0xb   : > { %938 = vmatpush3.bf16.msra.mxu1 (!%p164_p2), %v935_v13  ;;  %v919_v26 = vpack.c.bf16 (!%p164_p2), %v218_v22, %v217_v21  ;;  %v219_v27 = vld [vmem:[%s1249_s1 + $0x50] sm:$0xff] (!%p164_p2)  ;;  %v220_v28 = vld [vmem:[%s1249_s1 + $0x58] sm:$0xff] (!%p164_p2)  ;;  %v947_v29 = vpack.c.bf16 (!%p164_p2), %v686_v25, %v685_v24  ;;  %v687_v30 = vld [vmem:[%s1249_s1 + $0xc0] sm:$0xff] (!%p164_p2) }
   0xc   : > { %940 = vmatprep.subr.bf16.mxu1 (!%p164_p2), %v939_v17  ;;  %v688_v31 = vld [vmem:[%s1249_s1 + $0xc8] sm:$0xff] (!%p164_p2)  ;;  %v923_v32 = vpack.c.bf16 (!%p164_p2), %v220_v28, %v219_v27  ;;  %v221_v33 = vld [vmem:[%s1249_s1 + $0x60] sm:$0xff] (!%p164_p2)  ;;  %v689_v36 = vld [vmem:[%s1249_s1 + $0xd0] sm:$0xff] (!%p164_p2) }
   0xd   : > { %s1254_s23 = smov (!%p190_p3, %s674_s23), 15  ;;  %910 = vmatpush3.bf16.msra.mxu0 %v907_v5  ;;  %v222_v34 = vld [vmem:[%s1249_s1 + $0x68] sm:$0xff]  ;;  %v951_v35 = vpack.c.bf16 %v688_v31, %v687_v30  ;;  %v690_v37 = vld [vmem:[%s1249_s1 + $0xd8] sm:$0xff]  ;;  %v223_v39 = vld [vmem:[%s1249_s1 + $0x70] sm:$0xff] }
   0xe   : > { %s675_s6 = sshll.u32 %s1254_s23, 3  ;;  %912 = vmatprep.subr.bf16.mxu0 %v911_v8  ;;  %v927_v38 = vpack.c.bf16 %v222_v34, %v221_v33  ;;  %v224_v40 = vld [vmem:[%s1249_s1 + $0x78] sm:$0xff]  ;;  %v955_v41 = vpack.c.bf16 %v690_v37, %v689_v36  ;;  %v691_v42 = vld [vmem:[%s1249_s1 + $0xe0] sm:$0xff]  ;;  %v692_v43 = vld [vmem:[%s1249_s1 + $0xe8] sm:$0xff] }
   0xf   : > { %s1102_s16 = scalar_lea.vmem %s1248_s0, %s675_s6  ;;  %942 = vmatpush3.bf16.msra.mxu1 %v939_v17  ;;  %v931_v44 = vpack.c.bf16 %v224_v40, %v223_v39  ;;  %v959_v45 = vpack.c.bf16 %v692_v43, %v691_v42  ;;  %v693_v53 = vld [vmem:[%s1249_s1 + $0xf0] sm:$0xff]  ;;  %v694_v54 = vld [vmem:[%s1249_s1 + $0xf8] sm:$0xff]  ;;  %v483_v56 = vld [vmem:[%s1251_s3] sm:$0xff]  ;;  %s199_s7 = scalar_lea.vmem %s1252_s4, %s675_s6 }
  0x10   : > { %v201_v16 = vld [vmem:[%s1102_s16] sm:$0xff]  ;;  %944 = vmatprep.subr.bf16.mxu1 %v943_v23  ;;  %v202_v46 = vld [vmem:[%s1102_s16 + $0x8] sm:$0xff]  ;;  %v203_v47 = vld [vmem:[%s1102_s16 + $0x10] sm:$0xff]  ;;  %v963_v55 = vpack.c.bf16 %v694_v54, %v693_v53 }
  0x11   : > { %803 = vmatprep.mubr.f32.mxu0 %v201_v16  ;;  %914 = vmatpush3.bf16.msra.mxu0 %v911_v8  ;;  %v204_v48 = vld [vmem:[%s1102_s16 + $0x18] sm:$0xff]  ;;  %v205_v49 = vld [vmem:[%s1102_s16 + $0x20] sm:$0xff]  ;;  %v206_v50 = vld [vmem:[%s1102_s16 + $0x28] sm:$0xff] }
  0x12   : > { %916 = vmatprep.subr.bf16.mxu0 %v915_v19  ;;  %v207_v51 = vld [vmem:[%s1102_s16 + $0x30] sm:$0xff]  ;;  %v208_v52 = vld [vmem:[%s1102_s16 + $0x38] sm:$0xff]  ;;  %v484_v57 = vld [vmem:[%s1251_s3 + $0x8] sm:$0xff] }
  0x13   : > { %946 = vmatpush3.bf16.msra.mxu1 %v943_v23  ;;  %v485_v58 = vld [vmem:[%s1251_s3 + $0x10] sm:$0xff]  ;;  %v967_v59 = vpack.c.bf16 %v484_v57, %v483_v56  ;;  %v486_v60 = vld [vmem:[%s1251_s3 + $0x18] sm:$0xff]  ;;  %v487_v62 = vld [vmem:[%s1251_s3 + $0x20] sm:$0xff] }
  0x14   : > { %948 = vmatprep.subr.bf16.mxu1 %v947_v29  ;;  %v971_v61 = vpack.c.bf16 %v486_v60, %v485_v58  ;;  %v488_v63 = vld [vmem:[%s1251_s3 + $0x28] sm:$0xff]  ;;  %v489_v1 = vld [vmem:[%s1251_s3 + $0x30] sm:$0xff]  ;;  %v490_v2 = vld [vmem:[%s1251_s3 + $0x38] sm:$0xff] }
  0x15   : > { %918 = vmatpush3.bf16.msra.mxu0 %v915_v19  ;;  %v975_v0 = vpack.c.bf16 %v488_v63, %v487_v62  ;;  %v979_v3 = vpack.c.bf16 %v490_v2, %v489_v1  ;;  %v491_v4 = vld [vmem:[%s1251_s3 + $0x40] sm:$0xff]  ;;  %v492_v5 = vld [vmem:[%s1251_s3 + $0x48] sm:$0xff]  ;;  %v493_v7 = vld [vmem:[%s1251_s3 + $0x50] sm:$0xff] }
  0x16   : > { %920 = vmatprep.subr.bf16.mxu0 %v919_v26  ;;  %v983_v6 = vpack.c.bf16 %v492_v5, %v491_v4  ;;  %v494_v8 = vld [vmem:[%s1251_s3 + $0x58] sm:$0xff]  ;;  %v495_v10 = vld [vmem:[%s1251_s3 + $0x60] sm:$0xff]  ;;  %v496_v11 = vld [vmem:[%s1251_s3 + $0x68] sm:$0xff] }
  0x17   : > { %950 = vmatpush3.bf16.msra.mxu1 %v947_v29  ;;  %v987_v9 = vpack.c.bf16 %v494_v8, %v493_v7  ;;  %v991_v12 = vpack.c.bf16 %v496_v11, %v495_v10  ;;  %v678_v13 = vld [vmem:[%s1250_s2] ss:$0 sm:$0xff]  ;;  %v498_v39 = vld [vmem:[%s1251_s3 + $0x78] sm:$0xff] }
  0x18   : > { %952 = vmatprep.subr.bf16.mxu1 %v951_v35 }
  0x19   : > { %922 = vmatpush3.bf16.msra.mxu0 %v919_v26 }
  0x1a   : > { %924 = vmatprep.subr.bf16.mxu0 %v923_v32 }
  0x1b   : > { %954 = vmatpush3.bf16.msra.mxu1 %v951_v35 }
  0x1c   : > { %956 = vmatprep.subr.bf16.mxu1 %v955_v41 }
  0x1d   : > { %926 = vmatpush3.bf16.msra.mxu0 %v923_v32 }
  0x1e   : > { %928 = vmatprep.subr.bf16.mxu0 %v927_v38 }
  0x1f   : > { %958 = vmatpush3.bf16.msra.mxu1 %v955_v41  ;;  %v696_v41 = vld [vmem:[%s1250_s2 + $0x1] ss:$0 sm:$0xff] }
  0x20   : > { %960 = vmatprep.subr.bf16.mxu1 %v959_v45 }
  0x21   : > { %930 = vmatpush3.bf16.msra.mxu0 %v927_v38  ;;  %v497_v38 = vld [vmem:[%s1251_s3 + $0x70] sm:$0xff] }
  0x22   : > { %932 = vmatprep.subr.bf16.mxu0 %v931_v44  ;;  %v995_v40 = vpack.c.bf16 %v498_v39, %v497_v38 }
  0x23   : > { %962 = vmatpush3.bf16.msra.mxu1 %v959_v45 }
  0x24   : > { %964 = vmatprep.subr.bf16.mxu1 %v963_v55 }
  0x25   : > { %934 = vmatpush3.bf16.msra.mxu0 %v931_v44 }
  0x26   : > { %968 = vmatprep.subr.bf16.mxu0 %v967_v59 }
  0x27   : > { %966 = vmatpush3.bf16.msra.mxu1 %v963_v55 }
  0x28   : > { %804 = vmatmul.mubr.f32.vlgmr.msra.gmra.mrb[0].mxu0 %v202_v46  ;;  %999 = vmatprep.subr.bf16.mxu1 %v967_v59 }
  0x29   : > { %806 = vmatprep.mubr.f32.mxu0 %v203_v47  ;;  %970 = vmatpush3.bf16.msra.mxu0 %v967_v59 }
  0x2a   : > { %972 = vmatprep.subr.bf16.mxu0 %v971_v61 }
  0x2c   : > { %807 = vmatmul.mubr.f32.gmra.mrb[2].mxu0 %v204_v48 }
  0x2d   : > { %809 = vmatprep.mubr.f32.mxu0 %v205_v49  ;;  %974 = vmatpush3.bf16.msra.mxu0 %v971_v61 }
  0x2e   : > { %976 = vmatprep.subr.bf16.mxu0 %v975_v0 }
  0x30   : > { %810 = vmatmul.mubr.f32.gmra.mrb[4].mxu0 %v206_v50 }
  0x31   : > { %812 = vmatprep.mubr.f32.mxu0 %v207_v51  ;;  %978 = vmatpush3.bf16.msra.mxu0 %v975_v0 }
  0x32   : > { %980 = vmatprep.subr.bf16.mxu0 %v979_v3 }
  0x34   : > { %813 = vmatmul.mubr.f32.gmra.mrb[6].mxu0 %v208_v52 }
  0x35   : > { %982 = vmatpush3.bf16.msra.mxu0 %v979_v3 }
  0x36   : > { %984 = vmatprep.subr.bf16.mxu0 %v983_v6 }
  0x39   : > { %986 = vmatpush3.bf16.msra.mxu0 %v983_v6 }
  0x3a   : > { %988 = vmatprep.subr.bf16.mxu0 %v987_v9 }
  0x3d   : > { %990 = vmatpush3.bf16.msra.mxu0 %v987_v9 }
  0x3e   : > { %992 = vmatprep.subr.bf16.mxu0 %v991_v12 }
  0x41   : > { %994 = vmatpush3.bf16.msra.mxu0 %v991_v12 }
  0x42   : > { %996 = vmatprep.subr.bf16.mxu0 %v995_v40 }
  0x45   : > { %998 = vmatpush3.bf16.msra.mxu0 %v995_v40 }
  0xfb   : > { %v805_v14 = vpop.f32.mrb[0].mxu0 }
  0xfc   : > { %v304_v15 = vadd.f32 %v805_v14, %v678_v13  ;;  %v298_v16 = vpop.f32.mrb[1].mxu0 }
  0xfd   : > { %v299_v17 = vadd.f32 %v678_v13, %v298_v16 }
  0xfe   : > { %v338_v20 = vmax.f32 %v304_v15, 0.0 }
  0xff   : > { %v808_v18 = vpop.f32.mrb[2].mxu0  ;;  %v337_v19 = vmax.f32 %v299_v17, 0.0 }
 0x100   : > { %v314_v21 = vadd.f32 %v808_v18, %v678_v13  ;;  %v308_v22 = vpop.f32.mrb[3].mxu0 }
 0x101   : > { %v309_v23 = vadd.f32 %v678_v13, %v308_v22  ;;  %847 = vmatprep.mubr.f32.mxu1 %v337_v19 }
 0x102   : > { %848 = vmatmul.mubr.f32.vlgmr.msra.gmra.mrb[0].mxu1 %v338_v20  ;;  %v340_v26 = vmax.f32 %v314_v21, 0.0 }
 0x103   : > { %v339_v24 = vmax.f32 %v309_v23, 0.0  ;;  %v811_v25 = vpop.f32.mrb[4].mxu0  ;;  %1007 = vmatpush3.bf16.msra.mxu1 %v967_v59 }
 0x104   : > { %v324_v27 = vadd.f32 %v811_v25, %v678_v13  ;;  %v318_v28 = vpop.f32.mrb[5].mxu0  ;;  %1000 = vmatprep.subr.bf16.mxu1 %v971_v61 }
 0x105   : > { %v319_v29 = vadd.f32 %v678_v13, %v318_v28  ;;  %850 = vmatprep.mubr.f32.mxu1 %v339_v24 }
 0x106   : > { %851 = vmatmul.mubr.f32.gmra.mrb[2].mxu1 %v340_v26  ;;  %v342_v32 = vmax.f32 %v324_v27, 0.0 }
 0x107   : > { %v341_v30 = vmax.f32 %v319_v29, 0.0  ;;  %v814_v31 = vpop.f32.mrb[6].mxu0  ;;  %1008 = vmatpush3.bf16.msra.mxu1 %v971_v61 }
 0x108   : > { %v334_v33 = vadd.f32 %v814_v31, %v678_v13  ;;  %v328_v34 = vpop.f32.mrb[7].mxu0  ;;  %1001 = vmatprep.subr.bf16.mxu1 %v975_v0 }
 0x109   : > { %v329_v35 = vadd.f32 %v678_v13, %v328_v34  ;;  %853 = vmatprep.mubr.f32.mxu1 %v341_v30 }
 0x10a   : > { %854 = vmatmul.mubr.f32.gmra.mrb[4].mxu1 %v342_v32  ;;  %v344_v37 = vmax.f32 %v334_v33, 0.0 }
 0x10b   : > { %v343_v36 = vmax.f32 %v329_v35, 0.0  ;;  %1009 = vmatpush3.bf16.msra.mxu1 %v975_v0 }
 0x10c   : > { %1002 = vmatprep.subr.bf16.mxu1 %v979_v3 }
 0x10d   : > { %856 = vmatprep.mubr.f32.mxu1 %v343_v36 }
 0x10e   : > { %857 = vmatmul.mubr.f32.gmra.mrb[6].mxu1 %v344_v37 }
 0x10f   : > { %1010 = vmatpush3.bf16.msra.mxu1 %v979_v3 }
 0x110   : > { %1003 = vmatprep.subr.bf16.mxu1 %v983_v6 }
 0x113   : > { %1011 = vmatpush3.bf16.msra.mxu1 %v983_v6 }
 0x114   : > { %1004 = vmatprep.subr.bf16.mxu1 %v987_v9 }
 0x117   : > { %1012 = vmatpush3.bf16.msra.mxu1 %v987_v9 }
 0x118   : > { %1005 = vmatprep.subr.bf16.mxu1 %v991_v12 }
 0x11b   : > { %1013 = vmatpush3.bf16.msra.mxu1 %v991_v12 }
 0x11c   : > { %1006 = vmatprep.subr.bf16.mxu1 %v995_v40 }
 0x11f   : > { %1014 = vmatpush3.bf16.msra.mxu1 %v995_v40 }
 0x1d5   : > { %v849_v42 = vpop.f32.mrb[0].mxu1 }
 0x1d6   : > { %v442_v43 = vadd.f32 %v849_v42, %v696_v41  ;;  %v436_v44 = vpop.f32.mrb[1].mxu1 }
 0x1d7   : > { %v437_v45 = vadd.f32 %v696_v41, %v436_v44 }
 0x1d8   : > { %v476_v48 = vmax.f32 %v442_v43, 0.0 }
 0x1d9   : > { %v475_v46 = vmax.f32 %v437_v45, 0.0  ;;  %v852_v47 = vpop.f32.mrb[2].mxu1 }
 0x1da   : > { %v452_v49 = vadd.f32 %v852_v47, %v696_v41  ;;  %v446_v50 = vpop.f32.mrb[3].mxu1 }
 0x1db   : > { %v447_v51 = vadd.f32 %v696_v41, %v446_v50  ;;  %891 = vmatprep.mubr.f32.mxu0 %v475_v46 }
 0x1dc   : > { %892 = vmatmul.mubr.f32.vlgmr.msra.gmra.mrb[8].mxu0 %v476_v48  ;;  %v478_v54 = vmax.f32 %v452_v49, 0.0 }
 0x1dd   : > { %v477_v52 = vmax.f32 %v447_v51, 0.0  ;;  %v855_v53 = vpop.f32.mrb[4].mxu1 }
 0x1de   : > { %v462_v55 = vadd.f32 %v855_v53, %v696_v41  ;;  %v456_v56 = vpop.f32.mrb[5].mxu1 }
 0x1df   : > { %v457_v57 = vadd.f32 %v696_v41, %v456_v56  ;;  %894 = vmatprep.mubr.f32.mxu0 %v477_v52 }
 0x1e0   : > { %895 = vmatmul.mubr.f32.gmra.mrb[10].mxu0 %v478_v54  ;;  %v480_v60 = vmax.f32 %v462_v55, 0.0 }
 0x1e1   : > { %v479_v58 = vmax.f32 %v457_v57, 0.0  ;;  %v858_v59 = vpop.f32.mrb[6].mxu1 }
 0x1e2   : > { %v472_v61 = vadd.f32 %v858_v59, %v696_v41  ;;  %v466_v62 = vpop.f32.mrb[7].mxu1 }
 0x1e3   : > { %v467_v63 = vadd.f32 %v696_v41, %v466_v62  ;;  %897 = vmatprep.mubr.f32.mxu1 %v479_v58 }
 0x1e4   : > { %898 = vmatmul.mubr.f32.vlgmr.msra.gmra.mrb[8].mxu1 %v480_v60  ;;  %v482_v1 = vmax.f32 %v472_v61, 0.0 }
 0x1e5   : > { %v481_v0 = vmax.f32 %v467_v63, 0.0 }
 0x1e7   : > { %900 = vmatprep.mubr.f32.mxu1 %v481_v0 }
 0x1e8   : > { %901 = vmatmul.mubr.f32.gmra.mrb[10].mxu1 %v482_v1 }
 0x2af   : > { %v893_v2 = vpop.f32.mrb[8].mxu0 }
 0x2b0   : > { %606 = vst.msk [vmem:[%s199_s7 + $0x8] sm:$0xff] %vm604_vm0, %v893_v2  ;;  %v565_v3 = vpop.f32.mrb[9].mxu0 }
 0x2b1   : > { %605 = vst.msk [vmem:[%s199_s7] sm:$0xff] %vm604_vm0, %v565_v3 }
 0x2b3   : > { %v896_v4 = vpop.f32.mrb[10].mxu0 }
 0x2b4   : > { %608 = vst.msk [vmem:[%s199_s7 + $0x18] sm:$0xff] %vm604_vm0, %v896_v4  ;;  %v575_v5 = vpop.f32.mrb[11].mxu0 }
 0x2b5   : > { %607 = vst.msk [vmem:[%s199_s7 + $0x10] sm:$0xff] %vm604_vm0, %v575_v5 }
 0x2b7   : > { %v899_v6 = vpop.f32.mrb[8].mxu1 }
 0x2b8   : > { %610 = vst.msk [vmem:[%s199_s7 + $0x28] sm:$0xff] %vm604_vm0, %v899_v6  ;;  %v585_v7 = vpop.f32.mrb[9].mxu1 }
 0x2b9   : > { %609 = vst.msk [vmem:[%s199_s7 + $0x20] sm:$0xff] %vm604_vm0, %v585_v7 }
 0x2bb   : > { %v902_v8 = vpop.f32.mrb[10].mxu1 }
 0x2bc   : > { %612 = vst.msk [vmem:[%s199_s7 + $0x38] sm:$0xff] %vm604_vm0, %v902_v8  ;;  %v595_v9 = vpop.f32.mrb[11].mxu1 }
 0x2bd   : > { %611 = vst.msk [vmem:[%s199_s7 + $0x30] sm:$0xff] %vm604_vm0, %v595_v9 }
 0x2be PF: > { %s14_s15 = sadd.s32 1, %s1029_s15  }
 0x2bf   : > { %p11_p4 = scmp.ge.s32.totalorder %s14_s15, 4  }
 0x2c1   :  { %13 = sbr.rel (!%p11_p4) target bundleno = 1 (0x1), region = 68 }

</bundles_post_ra>
